<compile_context>
chip_gen: v5e
topology: v5e:2x2
jax: 0.10.0
libtpu: 0.0.40
codegen_flags: <defaults>
</compile_context>

<pallas_src>
import functools

import jax
import jax.numpy as jnp
from jax.experimental import pallas as pl
from jax.experimental.pallas import tpu as pltpu


_VMEM_LIMIT = 48 * 1024 * 1024  # stay under v7x's 64 MiB physical VMEM


def _round_up(x, m):
    return ((x + m - 1) // m) * m


def _row_tile(n, pref=256):
    """Largest legal row tile: `pref` when it divides n, else the full axis."""
    return pref if (n >= pref and n % pref == 0) else n


def _pad_cols(x, cp):
    c = x.shape[1]
    if c == cp:
        return x
    return jnp.pad(x, ((0, 0), (0, cp - c)))


def _compiler_params(dims):
    return pltpu.CompilerParams(dimension_semantics=dims,
                                vmem_limit_bytes=_VMEM_LIMIT)


# ---------------------------------------------------------------------------
# Pallas kernels
# ---------------------------------------------------------------------------

def _edge_prep_kernel(eh_ref, et_ref, rel_ref, neigh_ref, w_ref):
    """Per-edge message (tail*rel, bf16) and un-softmaxed attention scalar
       w = (||head*rel|| * ||tail*rel||)**2  (sqrt-free)."""
    rel = rel_ref[...]
    tail_rel = et_ref[...] * rel
    head_rel = eh_ref[...] * rel
    tn2 = jnp.sum(tail_rel * tail_rel, axis=1, keepdims=True)
    hn2 = jnp.sum(head_rel * head_rel, axis=1, keepdims=True)
    w_ref[...] = hn2 * tn2
    neigh_ref[...] = tail_rel.astype(jnp.bfloat16)


def _kg_scatter_kernel(tile_ne, neigh_ref, w_ref, head_ref, res_ref,
                       norm_ref, res_out_ref):
    """scatter_softmax(by head) + weighted scatter_sum for one tile of entities,
       fused with F.normalize and the residual accumulation.
       The one-hot mask is built in-vreg from head indices (never DMA'd);
       gathers/scatters are bf16 MXU matmuls with f32 accumulation."""
    start = pl.program_id(0) * tile_ne
    head = head_ref[...]                       # (E, 1) int32
    w = w_ref[...]                             # (E, 1) f32
    neigh16 = neigh_ref[...]                   # (E, Cp) bf16
    e = head.shape[0]

    col = jax.lax.broadcasted_iota(jnp.int32, (e, tile_ne), 1) + start
    mask = col == head                                           # (E, tile)
    mt16 = jnp.where(mask, 1.0, 0.0).astype(jnp.bfloat16)        # one-hot (exact)
    in_tile = (head >= start) & (head < start + tile_ne)         # (E, 1)

    # per-head max for a numerically stable softmax; gathered back per edge on
    # the MXU (one-hot @ seg_max.T).  The bf16 rounding of the max is shared by
    # every edge of a head so it cancels in the softmax ratio.
    masked_w = jnp.where(mask, w, jnp.float32(-1e30))            # (E, tile)
    seg_max = jnp.max(masked_w, axis=0, keepdims=True)           # (1, tile)
    per_edge_max = jax.lax.dot_general(
        mt16, seg_max.astype(jnp.bfloat16),
        dimension_numbers=(((1,), (1,)), ((), ())),
        preferred_element_type=jnp.float32)                      # (E, 1)

    # edges owned by other tiles get weight 0 (they contribute nothing here)
    exp_w = jnp.where(in_tile, jnp.exp(w - per_edge_max), 0.0)   # (E, 1)
    exp_w16 = exp_w.astype(jnp.bfloat16)
    msg16 = (neigh16 * exp_w).astype(jnp.bfloat16)               # (E, Cp)

    # scatter_sum of weighted messages and of softmax denominators:
    # one-hot^T @ x on the MXU (contraction over the edge axis).
    num = jax.lax.dot_general(
        mt16, msg16, dimension_numbers=(((0,), (0,)), ((), ())),
        preferred_element_type=jnp.float32)                      # (tile, Cp)
    den = jax.lax.dot_general(
        mt16, exp_w16, dimension_numbers=(((0,), (0,)), ((), ())),
        preferred_element_type=jnp.float32)                      # (tile, 1)
    agg = num * pl.reciprocal(jnp.maximum(den, jnp.float32(1e-30)), approx=True)

    # fused F.normalize(p=2, dim=1, eps=1e-12) + residual accumulation
    inv = jax.lax.rsqrt(jnp.maximum(
        jnp.sum(agg * agg, axis=1, keepdims=True), jnp.float32(1e-24)))
    out = agg * inv
    norm_ref[...] = out
    res_out_ref[...] = res_ref[...] + out


def _user_agg_kernel(inter_ref, ent_ref, u_ref, wgt_ref, res_ref,
                     norm_ref, res_out_ref, acc_ref):
    """user_agg = interact_mat @ entity_emb   (reduction over entity tiles)
       score    = softmax(user_emb @ weight.T)
       out      = user_agg + (score @ weight) * user_agg
       fused with F.normalize and the residual accumulation."""
    k = pl.program_id(1)

    @pl.when(k == 0)
    def _():
        acc_ref[...] = jnp.zeros_like(acc_ref)

    acc_ref[...] += jax.lax.dot_general(
        inter_ref[...], ent_ref[...].astype(jnp.bfloat16),
        dimension_numbers=(((1,), (0,)), ((), ())),
        preferred_element_type=jnp.float32)

    @pl.when(k == pl.num_programs(1) - 1)
    def _():
        user_agg = acc_ref[...]
        u = u_ref[...]
        W = wgt_ref[...]
        logits = jax.lax.dot_general(                            # u @ W.T
            u, W, dimension_numbers=(((1,), (1,)), ((), ())),
            preferred_element_type=jnp.float32)                  # (tu, R)
        m = jnp.max(logits, axis=-1, keepdims=True)
        e = jnp.exp(logits - m)
        score = e * pl.reciprocal(jnp.sum(e, axis=-1, keepdims=True), approx=True)
        proj = jnp.dot(score, W, preferred_element_type=jnp.float32)
        out = user_agg + proj * user_agg
        inv = jax.lax.rsqrt(jnp.maximum(
            jnp.sum(out * out, axis=-1, keepdims=True), jnp.float32(1e-24)))
        un = out * inv
        norm_ref[...] = un
        res_out_ref[...] = res_ref[...] + un


def _l2norm_kernel(x_ref, o_ref):
    x = x_ref[...]
    sq = jnp.sum(x * x, axis=1, keepdims=True)
    # eps guard so zero rows (zero-padded entities) give 0 instead of NaN
    o_ref[...] = x * jax.lax.rsqrt(jnp.maximum(sq, jnp.float32(1e-24)))


def _sim_kernel(a_ref, b_ref, o_ref):
    o_ref[...] = jax.lax.dot_general(
        a_ref[...], b_ref[...],
        dimension_numbers=(((1,), (1,)), ((), ())),
        preferred_element_type=jnp.float32)


# ---------------------------------------------------------------------------
# Pallas wrappers
# ---------------------------------------------------------------------------

def edge_prep(e_head, e_tail, rel_emb):
    e, cp = e_head.shape
    te = _row_tile(e)
    return pl.pallas_call(
        _edge_prep_kernel,
        out_shape=(jax.ShapeDtypeStruct((e, cp), jnp.bfloat16),
                   jax.ShapeDtypeStruct((e, 1), jnp.float32)),
        grid_spec=pltpu.PrefetchScalarGridSpec(
            num_scalar_prefetch=0, grid=(e // te,),
            in_specs=[pl.BlockSpec((te, cp), lambda i: (i, 0))] * 3,
            out_specs=[pl.BlockSpec((te, cp), lambda i: (i, 0)),
                       pl.BlockSpec((te, 1), lambda i: (i, 0))]),
        compiler_params=_compiler_params(("parallel",)),
    )(e_head, e_tail, rel_emb)


def kg_aggregate(neigh16, w, head2d, entity_res):
    e, cp = neigh16.shape
    ne = entity_res.shape[0]
    tile = _row_tile(ne)
    kernel = functools.partial(_kg_scatter_kernel, tile)
    # TODO(synk): at production edge counts the (E, Cp) edge arrays no longer
    # fit VMEM; that needs an extra E-tile reduction axis with a two-pass
    # (max, then sum) online segment softmax.
    return pl.pallas_call(
        kernel,
        out_shape=(jax.ShapeDtypeStruct((ne, cp), jnp.float32),
                   jax.ShapeDtypeStruct((ne, cp), jnp.float32)),
        grid_spec=pltpu.PrefetchScalarGridSpec(
            num_scalar_prefetch=0, grid=(ne // tile,),
            in_specs=[pl.BlockSpec((e, cp), lambda i: (0, 0)),
                      pl.BlockSpec((e, 1), lambda i: (0, 0)),
                      pl.BlockSpec((e, 1), lambda i: (0, 0)),
                      pl.BlockSpec((tile, cp), lambda i: (i, 0))],
            out_specs=[pl.BlockSpec((tile, cp), lambda i: (i, 0)),
                       pl.BlockSpec((tile, cp), lambda i: (i, 0))]),
        compiler_params=_compiler_params(("parallel",)),
    )(neigh16, w, head2d, entity_res)


def user_aggregate(inter16, entity_emb, user_emb, weight, user_res):
    nu, ne = inter16.shape
    cp = entity_emb.shape[1]
    r = weight.shape[0]
    tu = _row_tile(nu)
    tk = 512 if (ne >= 512 and ne % 512 == 0) else ne
    return pl.pallas_call(
        _user_agg_kernel,
        out_shape=(jax.ShapeDtypeStruct((nu, cp), jnp.float32),
                   jax.ShapeDtypeStruct((nu, cp), jnp.float32)),
        grid_spec=pltpu.PrefetchScalarGridSpec(
            num_scalar_prefetch=0, grid=(nu // tu, ne // tk),
            in_specs=[pl.BlockSpec((tu, tk), lambda i, k: (i, k)),
                      pl.BlockSpec((tk, cp), lambda i, k: (k, 0)),
                      pl.BlockSpec((tu, cp), lambda i, k: (i, 0)),
                      pl.BlockSpec((r, cp), lambda i, k: (0, 0)),
                      pl.BlockSpec((tu, cp), lambda i, k: (i, 0))],
            out_specs=[pl.BlockSpec((tu, cp), lambda i, k: (i, 0)),
                       pl.BlockSpec((tu, cp), lambda i, k: (i, 0))],
            scratch_shapes=[pltpu.VMEM((tu, cp), jnp.float32)]),
        compiler_params=_compiler_params(("parallel", "arbitrary")),
    )(inter16, entity_emb, user_emb, weight, user_res)


def l2_normalize(x):
    n, c = x.shape
    tr = _row_tile(n)
    return pl.pallas_call(
        _l2norm_kernel,
        out_shape=jax.ShapeDtypeStruct((n, c), jnp.float32),
        grid_spec=pltpu.PrefetchScalarGridSpec(
            num_scalar_prefetch=0, grid=(n // tr,),
            in_specs=[pl.BlockSpec((tr, c), lambda i: (i, 0))],
            out_specs=pl.BlockSpec((tr, c), lambda i: (i, 0))),
        compiler_params=_compiler_params(("parallel",)),
    )(x)


def cosine_sim(x):
    n, c = x.shape
    xn = l2_normalize(x)        # normalize once, reuse for every output tile
    t = _row_tile(n)
    return pl.pallas_call(
        _sim_kernel,
        out_shape=jax.ShapeDtypeStruct((n, n), jnp.float32),
        grid_spec=pltpu.PrefetchScalarGridSpec(
            num_scalar_prefetch=0, grid=(n // t, n // t),
            in_specs=[pl.BlockSpec((t, c), lambda i, j: (i, 0)),
                      pl.BlockSpec((t, c), lambda i, j: (j, 0))],
            out_specs=pl.BlockSpec((t, t), lambda i, j: (i, j))),
        compiler_params=_compiler_params(("parallel", "parallel")),
    )(xn, xn)


# ---------------------------------------------------------------------------
# GraphConv (MCCLK) in JAX + Pallas
# ---------------------------------------------------------------------------

class GraphConvPallas:
    def __init__(self, channel, n_hops, n_users, n_relations, interact_mat,
                 ind="cosine", node_dropout_rate=0.5, mess_dropout_rate=0.1,
                 key=None):
        self.n_relations = n_relations
        self.n_users = n_users
        self.n_entities = interact_mat.shape[1]
        self.n_hops = n_hops
        self.ind = ind
        self.topk = 10
        self.lambda_coeff = 0.5
        self.temperature = 0.2
        self.node_dropout_rate = node_dropout_rate
        self.mess_dropout_rate = mess_dropout_rate
        # xavier_uniform_(empty(n_relations - 1, channel))
        if key is None:
            key = jax.random.PRNGKey(42)
        bound = (6.0 / (channel + (n_relations - 1))) ** 0.5
        self.weight = jax.random.uniform(
            key, (n_relations - 1, channel), jnp.float32, -bound, bound)

    # ---------------- build_adj ----------------
    def build_adj(self, context, topk):
        n_entity = context.shape[0]
        sim = cosine_sim(context)                                 # Pallas (tiled)
        # TODO(synk): top_k has no clean Pallas equivalent -> jax.lax.top_k glue
        knn_val, knn_ind = jax.lax.top_k(sim, topk)               # (N, topk)
        rows = jnp.repeat(jnp.arange(n_entity), topk)
        adj = jnp.zeros((n_entity, n_entity), jnp.float32).at[
            rows, knn_ind.reshape(-1)].add(knn_val.reshape(-1))
        rowsum = jnp.sum(adj, axis=1)
        # guard rowsum <= 0 (torch's rowsum**-0.5 would give inf/NaN there)
        d_inv_sqrt = jnp.where(rowsum > 0.0,
                               jax.lax.rsqrt(jnp.maximum(rowsum, 1e-12)), 0.0)
        # L = D^-1/2 A D^-1/2 (dense equivalent of the sparse mms)
        return adj * d_inv_sqrt[:, None] * d_inv_sqrt[None, :]

    # ---------------- forward ----------------
    def forward(self, user_emb, entity_emb, edge_index, edge_type, interact_mat,
                mess_dropout=False, node_dropout=False):
        ne = self.n_entities
        c = entity_emb.shape[1]

        # pad / truncate entity rows to n_entities (torch branch)
        if entity_emb.shape[0] > ne:
            entity_emb = entity_emb[:ne]
        elif entity_emb.shape[0] < ne:
            pad = jnp.zeros((ne - entity_emb.shape[0], c), entity_emb.dtype)
            entity_emb = jnp.concatenate([entity_emb, pad], axis=0)

        # TODO(synk): node_dropout / mess_dropout are stochastic (edge sampling,
        # sparse dropout, nn.Dropout); deterministic eval path implemented.

        # zero-pad the channel axis to a lane-dense multiple of 128 (transparent:
        # pads stay zero through every matmul / norm / residual, sliced off at end)
        cp = _round_up(c, 128)
        ent = _pad_cols(entity_emb, cp)
        usr = _pad_cols(user_emb, cp)
        weight_p = _pad_cols(self.weight, cp)
        inter16 = interact_mat.astype(jnp.bfloat16)      # 0/1 values: exact in bf16

        head = jnp.clip(edge_index[0], 0, ne - 1).astype(jnp.int32)
        tail = jnp.clip(edge_index[1], 0, ne - 1).astype(jnp.int32)
        # Relation index chain matches torch:
        #   GraphConv:  clamp(edge_type, 0, n_relations-2)
        #   Aggregator: clamp(edge_type-1, 0, weight.shape[0]-1) then weight[et-1]
        # torch's negative index -1 wraps to the last row -> modulo here.
        edge_type = jnp.clip(edge_type, 0, self.n_relations - 2)
        et = jnp.clip(edge_type - 1, 0, self.n_relations - 2)
        rel_idx = jnp.mod(et - 1, self.n_relations - 1)
        rel_emb = weight_p[rel_idx]                      # (E, Cp) gather (glue)
        head2d = head[:, None]                           # (E, 1) int32 for the kernel

        origin_item_adj = self.build_adj(ent, self.topk)

        entity_res = ent
        user_res = usr

        for _ in range(self.n_hops):
            e_head = ent[head]                           # gathers stay in JAX glue
            e_tail = ent[tail]
            neigh16, w = edge_prep(e_head, e_tail, rel_emb)              # Pallas
            new_ent, entity_res = kg_aggregate(neigh16, w, head2d,
                                               entity_res)              # Pallas
            new_usr, user_res = user_aggregate(inter16, ent, usr,
                                               weight_p, user_res)      # Pallas
            ent, usr = new_ent, new_usr

        item_adj = ((1.0 - self.lambda_coeff)
                    * self.build_adj(entity_res, self.topk)
                    + self.lambda_coeff * origin_item_adj)
        return entity_res[:, :c], user_res[:, :c], item_adj


# ---------------------------------------------------------------------------
# main
# ---------------------------------------------------------------------------

if __name__ == "__main__":
    key = jax.random.PRNGKey(0)
    k0, k1, k2, k3, k4, k5 = jax.random.split(key, 6)

    C = 32          # channel
    N_USERS = 8
    N_ENTITIES = 64
    N_RELATIONS = 5
    N_EDGES = 128
    N_HOPS = 2

    user_emb = jax.random.normal(k0, (N_USERS, C), jnp.float32)
    entity_emb = jax.random.normal(k1, (N_ENTITIES, C), jnp.float32)
    interact_mat = (jax.random.uniform(k2, (N_USERS, N_ENTITIES)) < 0.2
                    ).astype(jnp.float32)                # dense stand-in for sparse
    edge_index = jax.random.randint(k3, (2, N_EDGES), 0, N_ENTITIES, jnp.int32)
    edge_type = jax.random.randint(k4, (N_EDGES,), 1, N_RELATIONS, jnp.int32)

    model = GraphConvPallas(channel=C, n_hops=N_HOPS, n_users=N_USERS,
                            n_relations=N_RELATIONS, interact_mat=interact_mat,
                            ind="cosine", key=k5)

    entity_res, user_res, item_adj = model.forward(
        user_emb, entity_emb, edge_index, edge_type, interact_mat,
        mess_dropout=False, node_dropout=False)

    jax.block_until_ready((entity_res, user_res, item_adj))
    assert entity_res.shape == (N_ENTITIES, C)
    assert user_res.shape == (N_USERS, C)
    assert item_adj.shape == (N_ENTITIES, N_ENTITIES)
    assert bool(jnp.all(jnp.isfinite(entity_res)))
    assert bool(jnp.all(jnp.isfinite(user_res)))
    assert bool(jnp.all(jnp.isfinite(item_adj)))
    print("KERNEL_OK")
</pallas_src>

<mosaic_0001>
module attributes {stable_mosaic.version = 11 : i64} {
  func.func @_l2norm_kernel(%arg0: i32, %arg1: memref<64x128xf32, #tpu.memory_space<vmem>>, %arg2: memref<64x128xf32, #tpu.memory_space<vmem>>) attributes {dimension_semantics = [#tpu.dimension_semantics<parallel>], iteration_bounds = array<i64: 1>, scalar_prefetch = 0 : i64, scratch_operands = 0 : i64, tpu.core_type = #tpu.core_type<tc>, window_params = [{transform_indices = @transform_0, window_bounds = array<i64: 64, 128>}, {transform_indices = @transform_1, window_bounds = array<i64: 64, 128>}]} {
    %c0 = arith.constant 0 : index
    %c0_0 = arith.constant 0 : index
    %0 = vector.load %arg1[%c0, %c0_0] : memref<64x128xf32, #tpu.memory_space<vmem>>, vector<64x128xf32>
    %1 = arith.mulf %0, %0 : vector<64x128xf32>
    %cst = arith.constant dense<0.000000e+00> : vector<64xf32>
    %2 = vector.multi_reduction <add>, %1, %cst [1] : vector<64x128xf32> to vector<64xf32>
    %3 = vector.shape_cast %2 : vector<64xf32> to vector<64x1xf32>
    %cst_1 = arith.constant 1.000000e-24 : f32
    %4 = vector.broadcast %cst_1 : f32 to vector<64x1xf32>
    %5 = arith.maximumf %3, %4 : vector<64x1xf32>
    %6 = math.rsqrt %5 : vector<64x1xf32>
    %7 = vector.broadcast %6 : vector<64x1xf32> to vector<64x128xf32>
    %8 = arith.mulf %0, %7 : vector<64x128xf32>
    %c0_2 = arith.constant 0 : index
    %c0_3 = arith.constant 0 : index
    %9 = vector.load %arg2[%c0_2, %c0_3] : memref<64x128xf32, #tpu.memory_space<vmem>>, vector<64x128xf32>
    tpu.vector_store %arg2[%c0_2, %c0_3], %8 {strides = array<i32>} : memref<64x128xf32, #tpu.memory_space<vmem>>, vector<64x128xf32>,
    return
  }
  func.func @transform_0(%arg0: i32) -> (i32, i32) {
    %c0_i32 = arith.constant 0 : i32
    %c0_i32_0 = arith.constant 0 : i32
    return %arg0, %c0_i32 : i32, i32
  }
  func.func @transform_1(%arg0: i32) -> (i32, i32) {
    %c0_i32 = arith.constant 0 : i32
    %c0_i32_0 = arith.constant 0 : i32
    return %arg0, %c0_i32 : i32, i32
  }
}

</mosaic_0001>

<bundles_post_ra>
// kernel: tpu_custom_call.1
= control target key start
LH: loop header
LB: loop body
LE: loop exit
PB: predicated region body
PF: predicated region fallthrough
CT: control target
= control target key end

     0   :  { %6 = vsyncpa [#allocation3], 0  ;;  %s341_s0 = inlined_call_operand.hbm [shape: f32[64,128], index: 0, kind: input, shape index: {}]   ;;  %s342_s1 = inlined_call_operand.hbm [shape: f32[64,128], index: 1, kind: output, shape index: {}]  }
   0x1   :  { %7 = vsyncpa [#allocation4], 0  ;;  %s12_s8 = sshll.u32 %s341_s0, 4  ;;  %s252_s9 = smov [#allocation2]   ;;  %s13_s8 = int_to_ptr.hbm [resolvable:$true] %s12_s8 }
   0x2   :  { %s14_s10 = sshll.u32 %s252_s9, 4  ;;  %s253_s11 = smov 128   ;;  %s15_s10 = int_to_ptr.vmem [resolvable:$true] %s14_s10 }
   0x3   :  { %s254_s12 = smov 8  }
   0x4   :  { %20 = dma.hbm_to_vmem [thread:$0]  %s13_s8, 1024, %s15_s10, [#allocation3], %s253_s11, %s253_s11, %s254_s12  }
   0x5   :  { %248 = dma.done.wait [#allocation3], 1024  }
   0x6   :  { %249 = vsyncadd [#allocation3], 4294966272  ;;  %v272_v0 = vld [vmem:[#allocation2 + $0x20] sm:$0xff]  ;;  %v274_v1 = vld [vmem:[#allocation2 + $0x10] sm:$0xff]  ;;  %s255_s0 = smov [#allocation5]   ;;  %s167_s16 = sshll.u32 %s342_s1, 4  ;;  %s168_s16 = int_to_ptr.hbm [resolvable:$true] %s167_s16 }
   0x7   :  { %v276_v2 = vld [vmem:[#allocation2] sm:$0xff]  ;;  %v37_v3 = vmul.f32 %v272_v0, %v272_v0  ;;  %v35_v4 = vmul.f32 %v274_v1, %v274_v1  ;;  %v284_v6 = vld [vmem:[#allocation2 + $0x28] sm:$0xff]  ;;  %v286_v7 = vld [vmem:[#allocation2 + $0x18] sm:$0xff]  ;;  %s165_s13 = sshll.u32 %s255_s0, 4  ;;  %s166_s13 = int_to_ptr.vmem [resolvable:$true] %s165_s13 }
   0x8   :  { %v33_v5 = vmul.f32 %v276_v2, %v276_v2  ;;  %v288_v8 = vld [vmem:[#allocation2 + $0x8] sm:$0xff]  ;;  %v38_v9 = vmul.f32 %v284_v6, %v284_v6  ;;  %v36_v10 = vmul.f32 %v286_v7, %v286_v7  ;;  %v296_v12 = vld [vmem:[#allocation2 + $0x38] sm:$0xff]  ;;  %v298_v13 = vld [vmem:[#allocation2 + $0x30] sm:$0xff] }
   0x9   :  { %49 = vadd.xlane.f32.xlu2 %v37_v3  ;;  %45 = vadd.xlane.f32.xlu1 %v35_v4  ;;  %v34_v11 = vmul.f32 %v288_v8, %v288_v8  ;;  %v40_v14 = vmul.f32 %v296_v12, %v296_v12  ;;  %v39_v15 = vmul.f32 %v298_v13, %v298_v13 }
   0xa   :  { %41 = vadd.xlane.f32.xlu0 %v33_v5 }
  0x11   :  { %51 = vadd.xlane.f32.xlu2 %v38_v9  ;;  %47 = vadd.xlane.f32.xlu1 %v36_v10 }
  0x12   :  { %43 = vadd.xlane.f32.xlu0 %v34_v11 }
  0x19   :  { %55 = vadd.xlane.f32.xlu1 %v40_v14 }
  0x1a   :  { %53 = vadd.xlane.f32.xlu0 %v39_v15 }
  0x7c   :  { %v50_v16 = vpop.xlane.xlu2 %49  ;;  %v46_v17 = vpop.xlane.xlu1 %45 }
  0x7d   :  { %v61_v18 = vmax.f32 %v50_v16, 1e-24  ;;  %v59_v19 = vmax.f32 %v46_v17, 1e-24  ;;  %v42_v20 = vpop.xlane.xlu0 %41 }
  0x7e   :  { %v57_v21 = vmax.f32 %v42_v20, 1e-24 }
  0x7f   :  { %184 = vrsqrt.f32 %v61_v18  ;;  %vm111_vm0 = vweird.f32 %v61_v18  ;;  %vm91_vm2 = vweird.f32 %v59_v19 }
  0x80   :  { %186 = vrsqrt.f32 %v59_v19  ;;  %vm71_vm6 = vweird.f32 %v57_v21 }
  0x81   :  { %188 = vrsqrt.f32 %v57_v21 }
  0x84   :  { %v52_v22 = vpop.xlane.xlu2 %51  ;;  %v48_v23 = vpop.xlane.xlu1 %47 }
  0x85   :  { %v185_v24 = vpop.eup %184  ;;  %v304_v25 = vmax.f32 %v52_v22, 1e-24  ;;  %v306_v26 = vmax.f32 %v48_v23, 1e-24  ;;  %v44_v27 = vpop.xlane.xlu0 %43 }
  0x86   :  { %v187_v28 = vpop.eup %186  ;;  %v106_v29 = vmul.f32 %v185_v24, %v61_v18  ;;  %v308_v30 = vmax.f32 %v44_v27, 1e-24  ;;  %vm112_vm1 = vweird.f32 %v185_v24 }
  0x87   :  { %v189_v31 = vpop.eup %188  ;;  %v86_v32 = vmul.f32 %v187_v28, %v59_v19  ;;  %190 = vrsqrt.f32 %v304_v25  ;;  %vm92_vm3 = vweird.f32 %v187_v28  ;;  %vm113_vm5 = vmor %vm111_vm0, %vm112_vm1  ;;  %vm121_vm9 = vweird.f32 %v304_v25 }
  0x88   :  { %v107_v33 = vmul.f32 %v185_v24, %v106_v29  ;;  %v66_v34 = vmul.f32 %v189_v31, %v57_v21  ;;  %192 = vrsqrt.f32 %v306_v26  ;;  %vm72_vm4 = vweird.f32 %v189_v31  ;;  %vm93_vm7 = vmor %vm91_vm2, %vm92_vm3 }
  0x89   :  { %v87_v35 = vmul.f32 %v187_v28, %v86_v32  ;;  %194 = vrsqrt.f32 %v308_v30  ;;  %vm73_vm8 = vmor %vm71_vm6, %vm72_vm4  ;;  %vm101_vm14 = vweird.f32 %v306_v26  ;;  %vm81_vm0 = vweird.f32 %v308_v30 }
  0x8a   :  { %v108_v36 = vmul.f32 0.5, %v107_v33  ;;  %v67_v37 = vmul.f32 %v189_v31, %v66_v34 }
  0x8b   :  { %v88_v38 = vmul.f32 0.5, %v87_v35 }
  0x8c   :  { %v109_v39 = vsub.f32 1.5, %v108_v36  ;;  %v68_v40 = vmul.f32 0.5, %v67_v37  ;;  %v56_v41 = vpop.xlane.xlu1 %55 }
  0x8d   :  { %v191_v42 = vpop.eup %190  ;;  %v89_v43 = vsub.f32 1.5, %v88_v38  ;;  %v313_v44 = vmax.f32 %v56_v41, 1e-24  ;;  %v54_v56 = vpop.xlane.xlu0 %53 }
  0x8e   :  { %v193_v45 = vpop.eup %192  ;;  %v110_v46 = vmul.f32 %v185_v24, %v109_v39  ;;  %v69_v47 = vsub.f32 1.5, %v68_v40  ;;  %v116_v48 = vmul.f32 %v191_v42, %v304_v25  ;;  %v63_v5 = vmax.f32 %v54_v56, 1e-24 }
  0x8f   :  { %v195_v49 = vpop.eup %194  ;;  %v90_v50 = vmul.f32 %v187_v28, %v89_v43  ;;  %v96_v51 = vmul.f32 %v193_v45, %v306_v26  ;;  %196 = vrsqrt.f32 %v313_v44  ;;  %vm122_vm10 = vweird.f32 %v191_v42 }
  0x90   :  { %v114_v52 = vsel %vm113_vm5, %v185_v24, %v110_v46  ;;  %v70_v53 = vmul.f32 %v189_v31, %v69_v47  ;;  %v117_v54 = vmul.f32 %v191_v42, %v116_v48  ;;  %v76_v55 = vmul.f32 %v195_v49, %v308_v30  ;;  %vm123_vm13 = vmor %vm121_vm9, %vm122_vm10 }
  0x91   :  { %v149_v57 = vmul.f32 %v114_v52, %v272_v0  ;;  %v94_v58 = vsel %vm93_vm7, %v187_v28, %v90_v50  ;;  %v97_v59 = vmul.f32 %v193_v45, %v96_v51  ;;  %vm102_vm11 = vweird.f32 %v193_v45 }
  0x92   :  { %v147_v60 = vmul.f32 %v94_v58, %v274_v1  ;;  %v74_v61 = vsel %vm73_vm8, %v189_v31, %v70_v53  ;;  %v118_v62 = vmul.f32 0.5, %v117_v54  ;;  %v77_v63 = vmul.f32 %v195_v49, %v76_v55  ;;  %vm103_vm15 = vmor %vm101_vm14, %vm102_vm11 }
  0x93   :  { %157 = vst [vmem:[#allocation5 + $0x20] sm:$0xff] %v149_v57  ;;  %v145_v3 = vmul.f32 %v74_v61, %v276_v2  ;;  %v98_v4 = vmul.f32 0.5, %v97_v59  ;;  %198 = vrsqrt.f32 %v63_v5  ;;  %vm82_vm12 = vweird.f32 %v195_v49 }
  0x94   :  { %155 = vst [vmem:[#allocation5 + $0x10] sm:$0xff] %v147_v60  ;;  %v119_v9 = vsub.f32 1.5, %v118_v62  ;;  %v78_v0 = vmul.f32 0.5, %v77_v63  ;;  %vm83_vm1 = vmor %vm81_vm0, %vm82_vm12  ;;  %vm141_vm3 = vweird.f32 %v313_v44  ;;  %vm131_vm6 = vweird.f32 %v63_v5 }
  0x95   :  { %v197_v10 = vpop.eup %196  ;;  %153 = vst [vmem:[#allocation5] sm:$0xff] %v145_v3  ;;  %v99_v11 = vsub.f32 1.5, %v98_v4 }
  0x96   :  { %v120_v1 = vmul.f32 %v191_v42, %v119_v9  ;;  %v79_v14 = vsub.f32 1.5, %v78_v0  ;;  %v136_v15 = vmul.f32 %v197_v10, %v313_v44  ;;  %vm142_vm2 = vweird.f32 %v197_v10 }
  0x97   :  { %v100_v2 = vmul.f32 %v193_v45, %v99_v11  ;;  %vm143_vm4 = vmor %vm141_vm3, %vm142_vm2 }
  0x98   :  { %v124_v16 = vsel %vm123_vm13, %v191_v42, %v120_v1  ;;  %v80_v17 = vmul.f32 %v195_v49, %v79_v14  ;;  %v137_v18 = vmul.f32 %v197_v10, %v136_v15 }
  0x99   :  { %v150_v19 = vmul.f32 %v124_v16, %v284_v6  ;;  %v104_v20 = vsel %vm103_vm15, %v193_v45, %v100_v2  ;;  %v199_v24 = vpop.eup %198 }
  0x9a   :  { %v148_v21 = vmul.f32 %v104_v20, %v286_v7  ;;  %v84_v22 = vsel %vm83_vm1, %v195_v49, %v80_v17  ;;  %v138_v23 = vmul.f32 0.5, %v137_v18  ;;  %v126_v27 = vmul.f32 %v199_v24, %v63_v5 }
  0x9b   :  { %158 = vst [vmem:[#allocation5 + $0x28] sm:$0xff] %v150_v19  ;;  %v146_v25 = vmul.f32 %v84_v22, %v288_v8  ;;  %vm132_vm5 = vweird.f32 %v199_v24 }
  0x9c   :  { %156 = vst [vmem:[#allocation5 + $0x18] sm:$0xff] %v148_v21  ;;  %v139_v26 = vsub.f32 1.5, %v138_v23  ;;  %v127_v29 = vmul.f32 %v199_v24, %v126_v27  ;;  %vm133_vm7 = vmor %vm131_vm6, %vm132_vm5 }
  0x9d   :  { %154 = vst [vmem:[#allocation5 + $0x8] sm:$0xff] %v146_v25 }
  0x9e   :  { %v140_v28 = vmul.f32 %v197_v10, %v139_v26  ;;  %v128_v30 = vmul.f32 0.5, %v127_v29 }
  0xa0   :  { %v144_v6 = vsel %vm143_vm4, %v197_v10, %v140_v28  ;;  %v129_v31 = vsub.f32 1.5, %v128_v30 }
  0xa1   :  { %v152_v7 = vmul.f32 %v144_v6, %v296_v12 }
  0xa2   :  { %v130_v32 = vmul.f32 %v199_v24, %v129_v31 }
  0xa3   :  { %160 = vst [vmem:[#allocation5 + $0x38] sm:$0xff] %v152_v7 }
  0xa4   :  { %v134_v8 = vsel %vm133_vm7, %v199_v24, %v130_v32 }
  0xa5   :  { %v151_v33 = vmul.f32 %v134_v8, %v298_v13 }
  0xa7   :  { %159 = vst [vmem:[#allocation5 + $0x30] sm:$0xff] %v151_v33 }
  0xa8   :  { %173 = dma.vmem_to_hbm [thread:$0]  %s166_s13, 1024, %s168_s16, [#allocation4], %s253_s11, %s253_s11, %s254_s12  }
  0xa9   :  { %250 = dma.done.wait [#allocation4], 1024  }
  0xaa   :  { %251 = vsyncadd [#allocation4], 4294966272 }
  0xab   :  { %178 = vsyncpa [#allocation3], 1 }
  0xac   :  { %179 = vsyncpa [#allocation4], 1 }

</bundles_post_ra>
